<compile_context>
chip_gen: v5e
topology: v5e:2x2
jax: 0.10.0
libtpu: 0.0.40
codegen_flags: <defaults>
</compile_context>

<pallas_src>
from collections import defaultdict

import jax
import jax.numpy as jnp
from jax.experimental import pallas as pl
from jax.experimental.pallas import tpu as pltpu

_DEFAULT_TARGET_IDS = ["attention_mask", "position_ids", "position_bias"]


# ---------------------------------------------------------------------------
# Pallas kernel: capture (copy) the three tensors via concurrent HBM->HBM DMA.
# ---------------------------------------------------------------------------
def _catcher_capture_kernel(hs_ref, mask_ref, pos_ref,
                            hs_out_ref, mask_out_ref, pos_out_ref,
                            sem):
    # Identity capture as three concurrent HBM->HBM DMAs.  No VMEM buffering,
    # no vector load/store traffic: start all three copies, then wait.
    hs_cp = pltpu.make_async_copy(hs_ref, hs_out_ref, sem.at[0])
    m_cp = pltpu.make_async_copy(mask_ref, mask_out_ref, sem.at[1])
    p_cp = pltpu.make_async_copy(pos_ref, pos_out_ref, sem.at[2])
    hs_cp.start()
    m_cp.start()
    p_cp.start()
    hs_cp.wait()
    m_cp.wait()
    p_cp.wait()


def _capture(hidden_states, attention_mask, position_ids):
    """Run the Pallas capture kernel; returns copies of the three inputs.

    Inputs and outputs stay in HBM (memory_space=pl.ANY); the kernel body
    drives the DMA engines directly, so there is no per-tensor VMEM tile,
    no (8,128) tiling constraint, and the same code scales from toy shapes
    to full calibration batches on v5e/v6e/v7x.
    """
    any_spec = pl.BlockSpec(memory_space=pl.ANY)

    out_shapes = (
        jax.ShapeDtypeStruct(hidden_states.shape, hidden_states.dtype),
        jax.ShapeDtypeStruct(attention_mask.shape, attention_mask.dtype),
        jax.ShapeDtypeStruct(position_ids.shape, position_ids.dtype),
    )

    return pl.pallas_call(
        _catcher_capture_kernel,
        out_shape=out_shapes,
        in_specs=[any_spec, any_spec, any_spec],
        out_specs=(any_spec, any_spec, any_spec),
        scratch_shapes=[pltpu.SemaphoreType.DMA((3,))],
    )(hidden_states, attention_mask, position_ids)


# ---------------------------------------------------------------------------
# Python wrapper reproducing Catcher's control flow.
# ---------------------------------------------------------------------------
class Catcher:
    def __init__(self, module=None, target_keys=None):
        self.module = module
        self.target_keys = target_keys
        self.cache = defaultdict(list)
        self.cache["inputs"] = []

    def _get_target_keys(self, input_keys):
        return [k for k in _DEFAULT_TARGET_IDS if k in input_keys]

    def forward(self, *args, **kwargs):
        if self.target_keys is None:
            self.target_keys = self._get_target_keys(kwargs.keys())

        # Hot path: capture tensors via the Pallas HBM->HBM DMA kernel.
        hs_cap, mask_cap, pos_cap = _capture(
            args[0],
            kwargs["attention_mask"],
            kwargs["position_ids"],
        )
        captured = {"attention_mask": mask_cap, "position_ids": pos_cap}

        self.cache["inputs"].append((hs_cap,) + tuple(args[1:]))
        for key in self.target_keys:
            self.cache[key].append(captured.get(key, kwargs.get(key)))

        # TODO(synk): `raise ValueError` is host-side Python control flow with
        # no Pallas equivalent; reproduced here outside the kernel.
        raise ValueError

    def get_cache(self):
        return self.cache


if __name__ == "__main__":
    key = jax.random.PRNGKey(0)
    k_hs, k_mask = jax.random.split(key)

    batch, seq, hidden = 2, 8, 32
    hidden_states = jax.random.normal(k_hs, (batch, seq, hidden), dtype=jnp.float32)
    attention_mask = (jax.random.uniform(k_mask, (batch, seq)) > 0.2).astype(jnp.float32)
    position_ids = jnp.tile(jnp.arange(seq, dtype=jnp.int32)[None, :], (batch, 1))

    catcher = Catcher(module=None, target_keys=None)

    raised = False
    try:
        catcher.forward(
            hidden_states,
            attention_mask=attention_mask,
            position_ids=position_ids,
        )
    except ValueError:
        raised = True

    cache = catcher.get_cache()
    (hs_cap,) = cache["inputs"][0]
    mask_cap = cache["attention_mask"][0]
    pos_cap = cache["position_ids"][0]

    jax.block_until_ready((hs_cap, mask_cap, pos_cap))

    assert raised, "Catcher.forward must raise ValueError"
    assert catcher.target_keys == ["attention_mask", "position_ids"]
    assert jnp.array_equal(hs_cap, hidden_states)
    assert jnp.array_equal(mask_cap, attention_mask)
    assert jnp.array_equal(pos_cap, position_ids)
    assert hs_cap.dtype == hidden_states.dtype
    assert pos_cap.dtype == position_ids.dtype

    print("KERNEL_OK")
</pallas_src>

<mosaic_0001>
module attributes {stable_mosaic.version = 11 : i64} {
  func.func @_catcher_capture_kernel(%arg0: memref<2x8x32xf32, #tpu.memory_space<any>>, %arg1: memref<2x8xf32, #tpu.memory_space<any>>, %arg2: memref<2x8xi32, #tpu.memory_space<any>>, %arg3: memref<2x8x32xf32, #tpu.memory_space<any>>, %arg4: memref<2x8xf32, #tpu.memory_space<any>>, %arg5: memref<2x8xi32, #tpu.memory_space<any>>, %arg6: memref<3x!tpu.dma_semaphore, #tpu.memory_space<semaphore_mem>>) attributes {dimension_semantics = [], scalar_prefetch = 0 : i64, scratch_operands = 1 : i64, tpu.core_type = #tpu.core_type<tc>} {
    %c0_i32 = arith.constant 0 : i32
    %0 = tpu.memref_slice %arg6[%c0_i32] : memref<3x!tpu.dma_semaphore, #tpu.memory_space<semaphore_mem>> -> memref<1x!tpu.dma_semaphore, #tpu.memory_space<semaphore_mem>>
    %1 = tpu.memref_squeeze %0 : memref<1x!tpu.dma_semaphore, #tpu.memory_space<semaphore_mem>> -> memref<!tpu.dma_semaphore, #tpu.memory_space<semaphore_mem>>
    tpu.enqueue_dma source(%arg0 : memref<2x8x32xf32, #tpu.memory_space<any>>) target(%arg3 : memref<2x8x32xf32, #tpu.memory_space<any>>) target_semaphore(%1 : memref<!tpu.dma_semaphore, #tpu.memory_space<semaphore_mem>>)
    %c1_i32 = arith.constant 1 : i32
    %2 = tpu.memref_slice %arg6[%c1_i32] : memref<3x!tpu.dma_semaphore, #tpu.memory_space<semaphore_mem>> -> memref<1x!tpu.dma_semaphore, #tpu.memory_space<semaphore_mem>>
    %3 = tpu.memref_squeeze %2 : memref<1x!tpu.dma_semaphore, #tpu.memory_space<semaphore_mem>> -> memref<!tpu.dma_semaphore, #tpu.memory_space<semaphore_mem>>
    tpu.enqueue_dma source(%arg1 : memref<2x8xf32, #tpu.memory_space<any>>) target(%arg4 : memref<2x8xf32, #tpu.memory_space<any>>) target_semaphore(%3 : memref<!tpu.dma_semaphore, #tpu.memory_space<semaphore_mem>>)
    %c2_i32 = arith.constant 2 : i32
    %4 = tpu.memref_slice %arg6[%c2_i32] : memref<3x!tpu.dma_semaphore, #tpu.memory_space<semaphore_mem>> -> memref<1x!tpu.dma_semaphore, #tpu.memory_space<semaphore_mem>>
    %5 = tpu.memref_squeeze %4 : memref<1x!tpu.dma_semaphore, #tpu.memory_space<semaphore_mem>> -> memref<!tpu.dma_semaphore, #tpu.memory_space<semaphore_mem>>
    tpu.enqueue_dma source(%arg2 : memref<2x8xi32, #tpu.memory_space<any>>) target(%arg5 : memref<2x8xi32, #tpu.memory_space<any>>) target_semaphore(%5 : memref<!tpu.dma_semaphore, #tpu.memory_space<semaphore_mem>>)
    %c0_i32_0 = arith.constant 0 : i32
    %6 = tpu.memref_slice %arg6[%c0_i32_0] : memref<3x!tpu.dma_semaphore, #tpu.memory_space<semaphore_mem>> -> memref<1x!tpu.dma_semaphore, #tpu.memory_space<semaphore_mem>>
    %7 = tpu.memref_squeeze %6 : memref<1x!tpu.dma_semaphore, #tpu.memory_space<semaphore_mem>> -> memref<!tpu.dma_semaphore, #tpu.memory_space<semaphore_mem>>
    tpu.wait_dma2 semaphore(%7 : memref<!tpu.dma_semaphore, #tpu.memory_space<semaphore_mem>>) src(%arg0 : memref<2x8x32xf32, #tpu.memory_space<any>>) dst(%arg3 : memref<2x8x32xf32, #tpu.memory_space<any>>)
    %c1_i32_1 = arith.constant 1 : i32
    %8 = tpu.memref_slice %arg6[%c1_i32_1] : memref<3x!tpu.dma_semaphore, #tpu.memory_space<semaphore_mem>> -> memref<1x!tpu.dma_semaphore, #tpu.memory_space<semaphore_mem>>
    %9 = tpu.memref_squeeze %8 : memref<1x!tpu.dma_semaphore, #tpu.memory_space<semaphore_mem>> -> memref<!tpu.dma_semaphore, #tpu.memory_space<semaphore_mem>>
    tpu.wait_dma2 semaphore(%9 : memref<!tpu.dma_semaphore, #tpu.memory_space<semaphore_mem>>) src(%arg1 : memref<2x8xf32, #tpu.memory_space<any>>) dst(%arg4 : memref<2x8xf32, #tpu.memory_space<any>>)
    %c2_i32_2 = arith.constant 2 : i32
    %10 = tpu.memref_slice %arg6[%c2_i32_2] : memref<3x!tpu.dma_semaphore, #tpu.memory_space<semaphore_mem>> -> memref<1x!tpu.dma_semaphore, #tpu.memory_space<semaphore_mem>>
    %11 = tpu.memref_squeeze %10 : memref<1x!tpu.dma_semaphore, #tpu.memory_space<semaphore_mem>> -> memref<!tpu.dma_semaphore, #tpu.memory_space<semaphore_mem>>
    tpu.wait_dma2 semaphore(%11 : memref<!tpu.dma_semaphore, #tpu.memory_space<semaphore_mem>>) src(%arg2 : memref<2x8xi32, #tpu.memory_space<any>>) dst(%arg5 : memref<2x8xi32, #tpu.memory_space<any>>)
    return
  }
}

</mosaic_0001>

<bundles_post_ra>
// kernel: tpu_custom_call.1
= control target key start
LH: loop header
LB: loop body
LE: loop exit
PB: predicated region body
PF: predicated region fallthrough
CT: control target
= control target key end

     0   :  { %s91_s27 = smov [#allocation2]   ;;  %s92_s28 = smov [#allocation3]   ;;  %s146_s0 = inlined_call_operand.hbm [shape: f32[2,8,32], index: 0, kind: input, shape index: {}]   ;;  %s147_s3 = inlined_call_operand.hbm [shape: f32[2,8,32], index: 3, kind: output, shape index: {0}]   ;;  %s148_s1 = inlined_call_operand.hbm [shape: f32[2,8], index: 1, kind: input, shape index: {}]   ;;  %s149_s4 = inlined_call_operand.hbm [shape: f32[2,8], index: 4, kind: output, shape index: {1}]   ;;  %s150_s2 = inlined_call_operand.hbm [shape: s32[2,8], index: 2, kind: input, shape index: {}]   ;;  %s151_s5 = inlined_call_operand.hbm [shape: s32[2,8], index: 5, kind: output, shape index: {2}]  }
   0x1   :  { %s15_s20 = sshll.u32 %s146_s0, 4  ;;  %s17_s23 = sshll.u32 %s147_s3, 4  ;;  %s16_s20 = int_to_ptr.hbm [resolvable:$true] %s15_s20  ;;  %s18_s23 = int_to_ptr.hbm [resolvable:$true] %s17_s23 }
   0x2   :  { %s27_s26 = sshll.u32 %s148_s1, 4  ;;  %s93_s29 = smov 0   ;;  %s28_s26 = int_to_ptr.hbm [resolvable:$true] %s27_s26 }
   0x3   :  { %21 = dma.general %s16_s20, 256, %s18_s23, %s91_s27, %s92_s28, [#allocation4], %s93_s29, 0  }
   0x4   :  { %s29_s7 = sshll.u32 %s149_s4, 4  ;;  %s39_s3 = sshll.u32 %s150_s2, 4  ;;  %s30_s7 = int_to_ptr.hbm [resolvable:$true] %s29_s7  ;;  %s40_s3 = int_to_ptr.hbm [resolvable:$true] %s39_s3 }
   0x5   :  { %s94_s9 = smov [#allocation2 + $0x1]   ;;  %s95_s10 = smov [#allocation5]  }
   0x6   :  { %33 = dma.general %s28_s26, 32, %s30_s7, %s94_s9, %s95_s10, [#allocation6], %s93_s29, 0  }
   0x7   :  { %s41_s12 = sshll.u32 %s151_s5, 4  ;;  %s96_s13 = smov [#allocation2 + $0x2]   ;;  %s42_s12 = int_to_ptr.hbm [resolvable:$true] %s41_s12 }
   0x8   :  { %s97_s14 = smov [#allocation7]  }
   0x9   :  { %45 = dma.general %s40_s3, 32, %s42_s12, %s96_s13, %s97_s14, [#allocation8], %s93_s29, 0  }
   0xa   :  { %85 = dma.done.wait [#allocation2], 256 }
   0xb   :  { %86 = vsyncadd [#allocation2], 4294967040 }
   0xc   :  { %87 = dma.done.wait [#allocation2 + $0x1], 32 }
   0xd   :  { %88 = vsyncadd [#allocation2 + $0x1], 4294967264 }
   0xe   :  { %89 = dma.done.wait [#allocation2 + $0x2], 32 }
   0xf   :  { %90 = vsyncadd [#allocation2 + $0x2], 4294967264 }
  0x10   :  { %55 = vsyncmov [#allocation2] }
  0x13   :  { %s56_s2 = vpop.sfrf %55 }
  0x14   :  { %p75_p0 = scmp.ne.s32.totalorder %s56_s2, 0 }
  0x16   :  { %60 = shalt.err (%p75_p0)  }
  0x17   :  { %62 = vsyncmov [#allocation2 + $0x1] }
  0x1a   :  { %s63_s4 = vpop.sfrf %62 }
  0x1b   :  { %p76_p1 = scmp.ne.s32.totalorder %s63_s4, 0 }
  0x1d   :  { %67 = shalt.err (%p76_p1)  }
  0x1e   :  { %69 = vsyncmov [#allocation2 + $0x2] }
  0x21   :  { %s70_s5 = vpop.sfrf %69 }
  0x22   :  { %p77_p2 = scmp.ne.s32.totalorder %s70_s5, 0 }
  0x24   :  { %74 = shalt.err (%p77_p2)  }

</bundles_post_ra>
